<compile_context>
chip_gen: v6e
topology: v6e:2x2x1
jax: 0.10.0
libtpu: 0.0.40
codegen_flags: <defaults>
</compile_context>

<pallas_src>
import functools

import jax
import jax.numpy as jnp
from jax.experimental import pallas as pl
from jax.experimental.pallas import tpu as pltpu


class InterpolationType:
    NEAREST = "nearest"
    BILINEAR = "bilinear"


def _round_up(v, m):
    return ((v + m - 1) // m) * m


def _vmem_capacity_bytes():
    """Physical VMEM per core; conservative 64 MiB fallback if unqueryable."""
    try:
        return int(pltpu.get_tpu_info().vmem_capacity_bytes)
    except Exception:  # noqa: BLE001 - any failure -> safe default
        return 64 * 1024 * 1024


# -----------------------------------------------------------------------------
# Fused kernel: build the bilinear one-hot tile in-register and accumulate the
# (tile_bc, tile_nin) @ (tile_nin, tile_nout) product into a f32 scratch.
# Grid: (bc_tiles, nout_tiles, k_band_tiles); k is the reduction axis (last).
# -----------------------------------------------------------------------------
def _unresample_kernel(kstart_ref, blen_ref, w_ref, i_ref, x_ref, o_ref,
                       acc_ref, *, w_in):
    j = pl.program_id(1)
    k = pl.program_id(2)

    @pl.when(k == 0)
    def _():
        acc_ref[...] = jnp.zeros_like(acc_ref)

    # Only the in-band reduction steps do any work; out-of-band steps re-use
    # the previously fetched x block (clamped index_map) and are skipped here.
    @pl.when(k < blen_ref[j])
    def _():
        tile_nin = x_ref.shape[1]
        tile_nout = o_ref.shape[1]
        k_abs = kstart_ref[j] + k                       # absolute k-tile index

        idx00 = i_ref[...]                              # (1, tile_nout) int32
        pix = (k_abs * tile_nin
               + jax.lax.broadcasted_iota(jnp.int32, (tile_nin, tile_nout), 0))
        diff = pix - idx00                              # (tile_nin, tile_nout)

        w = w_ref[...]                                  # (4, tile_nout) f32
        # The four corners live at fixed flat offsets {0, 1, W, W+1} from the
        # unclipped base index; invalid corners already carry zero weight.
        g = (jnp.where(diff == 0, w[0:1, :], 0.0)
             + jnp.where(diff == 1, w[1:2, :], 0.0)
             + jnp.where(diff == w_in, w[2:3, :], 0.0)
             + jnp.where(diff == w_in + 1, w[3:4, :], 0.0))

        acc_ref[...] += jnp.dot(x_ref[...], g.astype(x_ref.dtype),
                                preferred_element_type=jnp.float32)

    @pl.when(k == pl.num_programs(2) - 1)
    def _():
        o_ref[...] = acc_ref[...].astype(o_ref.dtype)


def unresample(x, sample_map, interpolation=InterpolationType.BILINEAR,
               interp_weights=None):
    """
    x:          (B, C, H_in, W_in)
    sample_map: (H_out, W_out, 2)  last dim is (x, y)
    returns:    (B, C, H_out, W_out)
    """
    if interpolation != InterpolationType.BILINEAR:
        # TODO(synk): nearest interpolation path not implemented.
        raise NotImplementedError("only BILINEAR interpolation is implemented")
    if interp_weights is not None:
        # TODO(synk): explicit interp_weights (num_interp_points) path not implemented.
        raise NotImplementedError("interp_weights path not implemented")

    B, C, H, W = x.shape
    Ho, Wo, _ = sample_map.shape
    bc = B * C
    n_in = H * W
    n_out = Ho * Wo

    # bf16 inputs stay bf16 on the MXU; everything else runs in f32.
    # Accumulation is always f32.
    is_bf16 = (x.dtype == jnp.bfloat16)
    compute_dtype = jnp.bfloat16 if is_bf16 else jnp.float32
    out_dtype = compute_dtype

    vmem_phys = _vmem_capacity_bytes()
    vmem_cap = (vmem_phys * 7) // 8            # headroom for Mosaic internals
    big_vmem = vmem_phys >= 96 * 1024 * 1024   # v5e/v6e (128 MiB) vs v7x (64)

    # ---- tile sizes ---------------------------------------------------------
    sub = 16 if is_bf16 else 8                 # bf16 packs 16 rows per vreg
    tile_bc_max = 512
    tile_nout_max = 2048 if big_vmem else 1024

    tile_bc = tile_bc_max if bc > tile_bc_max else _round_up(bc, sub)
    tile_nin = 512 if n_in > 512 else _round_up(n_in, 128)
    tile_nout = tile_nout_max if n_out > tile_nout_max else _round_up(n_out, 128)

    bc_pad = _round_up(bc, tile_bc)
    n_out_pad = _round_up(n_out, tile_nout)
    n_bc_t = bc_pad // tile_bc
    n_out_t = n_out_pad // tile_nout

    # v7x shards the "parallel" grid axes over two TensorCores: make sure at
    # least one of them has >= 2 blocks when the problem permits it.
    if n_bc_t == 1 and n_out_t == 1:
        if tile_nout >= 256:
            tile_nout = _round_up(tile_nout // 2, 128)
        elif tile_bc >= 2 * sub:
            tile_bc = _round_up(tile_bc // 2, sub)
        bc_pad = _round_up(bc, tile_bc)
        n_out_pad = _round_up(n_out, tile_nout)
        n_bc_t = bc_pad // tile_bc
        n_out_t = n_out_pad // tile_nout

    n_in_pad = _round_up(n_in, tile_nin)
    n_in_t = n_in_pad // tile_nin

    # ---- pack / pad x -------------------------------------------------------
    x_flat = x.reshape(bc, n_in).astype(compute_dtype)
    if bc_pad != bc or n_in_pad != n_in:
        x_flat = jnp.pad(x_flat, ((0, bc_pad - bc), (0, n_in_pad - n_in)))

    # ---- per-output-column tables (hoisted out of the kernel) ---------------
    sm = sample_map.astype(jnp.float32)
    sx = sm[..., 0].reshape(n_out)
    sy = sm[..., 1].reshape(n_out)
    x0f = jnp.floor(sx)
    y0f = jnp.floor(sy)
    dx = sx - x0f
    dy = sy - y0f
    x0 = x0f.astype(jnp.int32)
    y0 = y0f.astype(jnp.int32)

    vx0 = (x0 >= 0) & (x0 < W)
    vx1 = (x0 + 1 >= 0) & (x0 + 1 < W)
    vy0 = (y0 >= 0) & (y0 < H)
    vy1 = (y0 + 1 >= 0) & (y0 + 1 < H)

    zero = jnp.zeros_like(dx)
    w00 = jnp.where(vx0 & vy0, (1.0 - dx) * (1.0 - dy), zero)
    w01 = jnp.where(vx1 & vy0, dx * (1.0 - dy), zero)
    w10 = jnp.where(vx0 & vy1, (1.0 - dx) * dy, zero)
    w11 = jnp.where(vx1 & vy1, dx * dy, zero)
    idx00 = y0 * W + x0                                   # unclipped base index

    wtab = jnp.stack([w00, w01, w10, w11], axis=0)        # (4, n_out) f32
    itab = idx00[None, :]                                 # (1, n_out) int32
    if n_out_pad != n_out:
        # zero weights (padded outputs are exactly 0) + edge-padded indices so
        # the padded columns do not widen the per-tile band.
        wtab = jnp.pad(wtab, ((0, 0), (0, n_out_pad - n_out)))
        itab = jnp.pad(itab, ((0, 0), (0, n_out_pad - n_out)), mode="edge")

    # ---- per-output-tile band of input k-tiles (windowed contraction) -------
    idx_t = itab.reshape(n_out_t, tile_nout)
    lo = jnp.clip(jnp.min(idx_t, axis=1), 0, n_in - 1)
    hi = jnp.clip(jnp.max(idx_t, axis=1) + (W + 1), 0, n_in - 1)
    lo_t = lo // tile_nin
    hi_t = hi // tile_nin
    kstart = lo_t.astype(jnp.int32)                       # (n_out_t,)
    blen = (hi_t - lo_t + 1).astype(jnp.int32)            # (n_out_t,), >= 1
    try:
        kb = int(jnp.max(blen))                           # static band depth
    except Exception:  # noqa: BLE001 - traced under jit: full (masked) scan
        kb = n_in_t
    kb = max(1, min(kb, n_in_t))

    # ---- VMEM budget & cost estimate ----------------------------------------
    itemsize = jnp.dtype(compute_dtype).itemsize
    g_build = 3 * tile_nin * tile_nout * 4                # in-register temporaries
    per_step = (2 * itemsize * tile_bc * tile_nin         # x, double-buffered
                + 2 * itemsize * tile_bc * tile_nout      # out, double-buffered
                + 2 * (4 * 4 + 4) * tile_nout             # wtab + itab
                + 4 * tile_bc * tile_nout                 # f32 accumulator
                + g_build)
    vmem_limit = int(min(vmem_cap, max(per_step * 3 // 2, 32 * 1024 * 1024)))

    cost = pl.CostEstimate(
        flops=2 * bc_pad * n_out_pad * kb * tile_nin,
        transcendentals=0,
        bytes_accessed=(
            # x is re-streamed once per output tile, restricted to its k band
            n_out_t * bc_pad * kb * tile_nin * itemsize
            # per-column tables, re-read per (bc, k) step
            + n_bc_t * kb * n_out_pad * (4 * 4 + 4)
            # output
            + bc_pad * n_out_pad * jnp.dtype(out_dtype).itemsize),
    )

    # ---- fused banded matmul -------------------------------------------------
    grid_spec = pltpu.PrefetchScalarGridSpec(
        num_scalar_prefetch=2,
        grid=(n_bc_t, n_out_t, kb),
        in_specs=[
            pl.BlockSpec((4, tile_nout), lambda i, j, k, ks, bl: (0, j)),
            pl.BlockSpec((1, tile_nout), lambda i, j, k, ks, bl: (0, j)),
            # k axis restricted to the per-output-tile band; out-of-band steps
            # clamp to the last in-band block (no new DMA, compute skipped).
            pl.BlockSpec(
                (tile_bc, tile_nin),
                lambda i, j, k, ks, bl: (i, ks[j] + jnp.minimum(k, bl[j] - 1))),
        ],
        out_specs=pl.BlockSpec((tile_bc, tile_nout),
                               lambda i, j, k, ks, bl: (i, j)),
        scratch_shapes=[pltpu.VMEM((tile_bc, tile_nout), jnp.float32)],
    )

    out_flat = pl.pallas_call(
        functools.partial(_unresample_kernel, w_in=W),
        out_shape=jax.ShapeDtypeStruct((bc_pad, n_out_pad), out_dtype),
        grid_spec=grid_spec,
        compiler_params=pltpu.CompilerParams(
            dimension_semantics=("parallel", "parallel", "arbitrary"),
            vmem_limit_bytes=vmem_limit),
        cost_estimate=cost,
    )(kstart, blen, wtab, itab, x_flat)

    return out_flat[:bc, :n_out].reshape(B, C, Ho, Wo)


class Unresample:
    """JAX/Pallas port of the PyTorch Unresample module (no parameters)."""

    def __init__(self, interpolation=InterpolationType.BILINEAR):
        self.interp = interpolation

    def __call__(self, x, sample_map, interp_weights=None):
        return unresample(x, sample_map, self.interp, interp_weights)


def _reference_unresample(x, sample_map):
    """Pure-JAX reference (bilinear, out-of-bounds corners contribute zero)."""
    B, C, H, W = x.shape
    Ho, Wo, _ = sample_map.shape
    x_flat = x.reshape(B * C, H * W)
    sx = sample_map[..., 0].reshape(-1)
    sy = sample_map[..., 1].reshape(-1)
    x0 = jnp.floor(sx).astype(jnp.int32)
    y0 = jnp.floor(sy).astype(jnp.int32)
    dx = sx - x0
    dy = sy - y0
    acc = jnp.zeros((B * C, Ho * Wo), jnp.float32)
    for xo, yo, w in ((0, 0, (1 - dx) * (1 - dy)),
                      (1, 0, dx * (1 - dy)),
                      (0, 1, (1 - dx) * dy),
                      (1, 1, dx * dy)):
        xc, yc = x0 + xo, y0 + yo
        valid = (xc >= 0) & (xc < W) & (yc >= 0) & (yc < H)
        idx = jnp.clip(yc, 0, H - 1) * W + jnp.clip(xc, 0, W - 1)
        vals = x_flat[:, idx]                               # (BC, N_out)
        acc = acc + vals * jnp.where(valid, w, 0.0)[None, :]
    return acc.reshape(B, C, Ho, Wo)


if __name__ == "__main__":
    key = jax.random.PRNGKey(0)
    k_x, k_map = jax.random.split(key)

    B, C, H_in, W_in = 2, 4, 16, 16
    H_out, W_out = 8, 8

    x = jax.random.normal(k_x, (B, C, H_in, W_in), dtype=jnp.float32)
    # Real-valued sample locations (x in [-1, W_in], y in [-1, H_in]) so both
    # interior and slightly out-of-bounds samples are exercised.
    u = jax.random.uniform(k_map, (H_out, W_out, 2), dtype=jnp.float32)
    sample_map = jnp.stack(
        [u[..., 0] * (W_in + 1.0) - 1.0,
         u[..., 1] * (H_in + 1.0) - 1.0], axis=-1)

    layer = Unresample(InterpolationType.BILINEAR)
    out = layer(x, sample_map)
    out = jax.block_until_ready(out)

    ref = _reference_unresample(x, sample_map)
    assert out.shape == (B, C, H_out, W_out)
    assert jnp.allclose(out, ref, atol=1e-5, rtol=1e-5), "mismatch vs reference"

    print("KERNEL_OK")
</pallas_src>

<mosaic_0001>
module attributes {stable_mosaic.version = 11 : i64} {
  func.func @_unresample_kernel(%arg0: i32, %arg1: i32, %arg2: i32, %arg3: memref<1xi32, #tpu.memory_space<smem>>, %arg4: memref<1xi32, #tpu.memory_space<smem>>, %arg5: memref<4x128xf32, #tpu.memory_space<vmem>>, %arg6: memref<1x128xi32, #tpu.memory_space<vmem>>, %arg7: memref<8x256xf32, #tpu.memory_space<vmem>>, %arg8: memref<8x128xf32, #tpu.memory_space<vmem>>, %arg9: memref<8x128xf32, #tpu.memory_space<vmem>>) attributes {dimension_semantics = [#tpu.dimension_semantics<parallel>, #tpu.dimension_semantics<parallel>, #tpu.dimension_semantics<arbitrary>], iteration_bounds = array<i64: 1, 1, 1>, scalar_prefetch = 2 : i64, scratch_operands = 1 : i64, tpu.core_type = #tpu.core_type<tc>, window_params = [{transform_indices = @transform_0, window_bounds = array<i64: 4, 128>}, {transform_indices = @transform_1, window_bounds = array<i64: 1, 128>}, {transform_indices = @transform_2, window_bounds = array<i64: 8, 256>}, {transform_indices = @transform_3, window_bounds = array<i64: 8, 128>}]} {
    %c0_i32 = arith.constant 0 : i32
    %0 = arith.cmpi eq, %arg2, %c0_i32 : i32
    %1 = arith.extui %0 : i1 to i32
    %c0_i32_0 = arith.constant 0 : i32
    %2 = arith.cmpi ne, %1, %c0_i32_0 : i32
    scf.if %2 {
      %cst = arith.constant 0.000000e+00 : f32
      %11 = vector.broadcast %cst : f32 to vector<8x128xf32>
      %c0 = arith.constant 0 : index
      %c0_4 = arith.constant 0 : index
      %12 = vector.load %arg9[%c0, %c0_4] : memref<8x128xf32, #tpu.memory_space<vmem>>, vector<8x128xf32>
      tpu.vector_store %arg9[%c0, %c0_4], %11 {strides = array<i32>} : memref<8x128xf32, #tpu.memory_space<vmem>>, vector<8x128xf32>,
    } else {
    }
    %3 = arith.index_cast %arg1 : i32 to index
    %4 = memref.load %arg4[%3] : memref<1xi32, #tpu.memory_space<smem>>
    %5 = arith.cmpi slt, %arg2, %4 : i32
    %6 = arith.extui %5 : i1 to i32
    %c0_i32_1 = arith.constant 0 : i32
    %7 = arith.cmpi ne, %6, %c0_i32_1 : i32
    scf.if %7 {
      %11 = arith.index_cast %arg1 : i32 to index
      %12 = memref.load %arg3[%11] : memref<1xi32, #tpu.memory_space<smem>>
      %13 = arith.addi %12, %arg2 : i32
      %c0 = arith.constant 0 : index
      %c0_4 = arith.constant 0 : index
      %14 = vector.load %arg6[%c0, %c0_4] : memref<1x128xi32, #tpu.memory_space<vmem>>, vector<1x128xi32>
      %c256_i32 = arith.constant 256 : i32
      %15 = arith.muli %13, %c256_i32 : i32
      %16 = tpu.iota {dimensions = array<i32: 0>} : vector<256x128xi32>
      %17 = vector.broadcast %15 : i32 to vector<256x128xi32>
      %18 = arith.addi %17, %16 : vector<256x128xi32>
      %19 = vector.broadcast %14 : vector<1x128xi32> to vector<256x128xi32>
      %20 = arith.subi %18, %19 : vector<256x128xi32>
      %c0_5 = arith.constant 0 : index
      %c0_6 = arith.constant 0 : index
      %21 = vector.load %arg5[%c0_5, %c0_6] : memref<4x128xf32, #tpu.memory_space<vmem>>, vector<4x128xf32>
      %c0_i32_7 = arith.constant 0 : i32
      %22 = vector.broadcast %c0_i32_7 : i32 to vector<256x128xi32>
      %23 = arith.cmpi eq, %20, %22 : vector<256x128xi32>
      %24 = vector.extract_strided_slice %21 {offsets = [0, 0], sizes = [1, 128], strides = [1, 1]} : vector<4x128xf32> to vector<1x128xf32>
      %cst = arith.constant 0.000000e+00 : f32
      %25 = vector.shape_cast %24 : vector<1x128xf32> to vector<1x128xf32>
      %26 = vector.broadcast %25 : vector<1x128xf32> to vector<256x128xf32>
      %27 = vector.broadcast %cst : f32 to vector<256x128xf32>
      %28 = arith.select %23, %26, %27 : vector<256x128xi1>, vector<256x128xf32>
      %c1_i32 = arith.constant 1 : i32
      %29 = vector.broadcast %c1_i32 : i32 to vector<256x128xi32>
      %30 = arith.cmpi eq, %20, %29 : vector<256x128xi32>
      %31 = vector.extract_strided_slice %21 {offsets = [1, 0], sizes = [1, 128], strides = [1, 1]} : vector<4x128xf32> to vector<1x128xf32>
      %cst_8 = arith.constant 0.000000e+00 : f32
      %32 = vector.shape_cast %31 : vector<1x128xf32> to vector<1x128xf32>
      %33 = vector.broadcast %32 : vector<1x128xf32> to vector<256x128xf32>
      %34 = vector.broadcast %cst_8 : f32 to vector<256x128xf32>
      %35 = arith.select %30, %33, %34 : vector<256x128xi1>, vector<256x128xf32>
      %36 = arith.addf %28, %35 : vector<256x128xf32>
      %c16_i32 = arith.constant 16 : i32
      %37 = vector.broadcast %c16_i32 : i32 to vector<256x128xi32>
      %38 = arith.cmpi eq, %20, %37 : vector<256x128xi32>
      %39 = vector.extract_strided_slice %21 {offsets = [2, 0], sizes = [1, 128], strides = [1, 1]} : vector<4x128xf32> to vector<1x128xf32>
      %cst_9 = arith.constant 0.000000e+00 : f32
      %40 = vector.shape_cast %39 : vector<1x128xf32> to vector<1x128xf32>
      %41 = vector.broadcast %40 : vector<1x128xf32> to vector<256x128xf32>
      %42 = vector.broadcast %cst_9 : f32 to vector<256x128xf32>
      %43 = arith.select %38, %41, %42 : vector<256x128xi1>, vector<256x128xf32>
      %44 = arith.addf %36, %43 : vector<256x128xf32>
      %c17_i32 = arith.constant 17 : i32
      %45 = vector.broadcast %c17_i32 : i32 to vector<256x128xi32>
      %46 = arith.cmpi eq, %20, %45 : vector<256x128xi32>
      %47 = vector.extract_strided_slice %21 {offsets = [3, 0], sizes = [1, 128], strides = [1, 1]} : vector<4x128xf32> to vector<1x128xf32>
      %cst_10 = arith.constant 0.000000e+00 : f32
      %48 = vector.shape_cast %47 : vector<1x128xf32> to vector<1x128xf32>
      %49 = vector.broadcast %48 : vector<1x128xf32> to vector<256x128xf32>
      %50 = vector.broadcast %cst_10 : f32 to vector<256x128xf32>
      %51 = arith.select %46, %49, %50 : vector<256x128xi1>, vector<256x128xf32>
      %52 = arith.addf %44, %51 : vector<256x128xf32>
      %c0_11 = arith.constant 0 : index
      %c0_12 = arith.constant 0 : index
      %53 = vector.load %arg9[%c0_11, %c0_12] : memref<8x128xf32, #tpu.memory_space<vmem>>, vector<8x128xf32>
      %c0_13 = arith.constant 0 : index
      %c0_14 = arith.constant 0 : index
      %54 = vector.load %arg7[%c0_13, %c0_14] : memref<8x256xf32, #tpu.memory_space<vmem>>, vector<8x256xf32>
      %cst_15 = arith.constant dense<0.000000e+00> : vector<8x128xf32>
      %55 = tpu.matmul %54, %52, %cst_15 {dimension_numbers = #tpu.dot_dimension_numbers<[1], [0], [0], [1], [0, 0, 1, 1], [], []>} : vector<8x256xf32>, vector<256x128xf32>, vector<8x128xf32> -> vector<8x128xf32>
      %56 = arith.addf %53, %55 : vector<8x128xf32>
      %c0_16 = arith.constant 0 : index
      %c0_17 = arith.constant 0 : index
      %57 = vector.load %arg9[%c0_16, %c0_17] : memref<8x128xf32, #tpu.memory_space<vmem>>, vector<8x128xf32>
      tpu.vector_store %arg9[%c0_16, %c0_17], %56 {strides = array<i32>} : memref<8x128xf32, #tpu.memory_space<vmem>>, vector<8x128xf32>,
    } else {
    }
    %c0_i32_2 = arith.constant 0 : i32
    %8 = arith.cmpi eq, %arg2, %c0_i32_2 : i32
    %9 = arith.extui %8 : i1 to i32
    %c0_i32_3 = arith.constant 0 : i32
    %10 = arith.cmpi ne, %9, %c0_i32_3 : i32
    scf.if %10 {
      %c0 = arith.constant 0 : index
      %c0_4 = arith.constant 0 : index
      %11 = vector.load %arg9[%c0, %c0_4] : memref<8x128xf32, #tpu.memory_space<vmem>>, vector<8x128xf32>
      %c0_5 = arith.constant 0 : index
      %c0_6 = arith.constant 0 : index
      %12 = vector.load %arg8[%c0_5, %c0_6] : memref<8x128xf32, #tpu.memory_space<vmem>>, vector<8x128xf32>
      tpu.vector_store %arg8[%c0_5, %c0_6], %11 {strides = array<i32>} : memref<8x128xf32, #tpu.memory_space<vmem>>, vector<8x128xf32>,
    } else {
    }
    return
  }
  func.func @transform_0(%arg0: i32, %arg1: i32, %arg2: i32, %arg3: memref<1xi32, #tpu.memory_space<smem>>, %arg4: memref<1xi32, #tpu.memory_space<smem>>) -> (i32, i32) {
    %c0_i32 = arith.constant 0 : i32
    %c0_i32_0 = arith.constant 0 : i32
    return %c0_i32, %arg1 : i32, i32
  }
  func.func @transform_1(%arg0: i32, %arg1: i32, %arg2: i32, %arg3: memref<1xi32, #tpu.memory_space<smem>>, %arg4: memref<1xi32, #tpu.memory_space<smem>>) -> (i32, i32) {
    %c0_i32 = arith.constant 0 : i32
    %c0_i32_0 = arith.constant 0 : i32
    return %c0_i32, %arg1 : i32, i32
  }
  func.func @transform_2(%arg0: i32, %arg1: i32, %arg2: i32, %arg3: memref<1xi32, #tpu.memory_space<smem>>, %arg4: memref<1xi32, #tpu.memory_space<smem>>) -> (i32, i32) {
    %0 = arith.index_cast %arg1 : i32 to index
    %1 = memref.load %arg3[%0] : memref<1xi32, #tpu.memory_space<smem>>
    %2 = arith.index_cast %arg1 : i32 to index
    %3 = memref.load %arg4[%2] : memref<1xi32, #tpu.memory_space<smem>>
    %c1_i32 = arith.constant 1 : i32
    %4 = arith.subi %3, %c1_i32 : i32
    %5 = arith.minsi %arg2, %4 : i32
    %6 = arith.addi %1, %5 : i32
    %c0_i32 = arith.constant 0 : i32
    return %arg0, %6 : i32, i32
  }
  func.func @transform_3(%arg0: i32, %arg1: i32, %arg2: i32, %arg3: memref<1xi32, #tpu.memory_space<smem>>, %arg4: memref<1xi32, #tpu.memory_space<smem>>) -> (i32, i32) {
    %c0_i32 = arith.constant 0 : i32
    return %arg0, %arg1 : i32, i32
  }
}

</mosaic_0001>

<bundles_post_ra>
// kernel: tpu_custom_call.1
= control target key start
LH: loop header
LB: loop body
LE: loop exit
PB: predicated region body
PF: predicated region fallthrough
CT: control target
= control target key end

     0   :  { %s1040_s0 = inlined_call_operand.<no memory space> [shape: s32[1], index: 0, kind: input, shape index: {}]   ;;  %s1041_s1 = inlined_call_operand.<no memory space> [shape: s32[1], index: 1, kind: input, shape index: {}]   ;;  %s1042_s2 = inlined_call_operand.vmem [shape: f32[4,128], index: 2, kind: input, shape index: {}]   ;;  %s1043_s3 = inlined_call_operand.vmem [shape: s32[1,128], index: 3, kind: input, shape index: {}]   ;;  %s1044_s4 = inlined_call_operand.hbm [shape: f32[8,256], index: 4, kind: input, shape index: {}]   ;;  %s1045_s5 = inlined_call_operand.hbm [shape: f32[8,128], index: 5, kind: output, shape index: {}]  }
   0x1   :  { %10 = sst [smem:[#allocation4]] %s1040_s0 }
   0x2   :  { %12 = vsyncpa [#allocation7], 0 }
   0x3   :  { %13 = vsyncpa [#allocation8], 0  ;;  %s20_s20 = sld [smem:[#allocation4]]  ;;  %s630_s23 = sadd.s32 4294967295, %s1041_s1 }
   0x4   :  { %p631_p0 = scmp.gt.s32.totalorder %s630_s23, 0  ;;  %s723_s24 = smov [#allocation6]  }
   0x5   :  { %s33_s25 = sshll.u32 %s723_s24, 4  ;;  %s679_s8 = scalar_lea.hbm %s1044_s4, 256  ;;  %s34_s25 = int_to_ptr.vmem [resolvable:$true] %s33_s25 }
   0x6   :  { %s1047_s23 = smov (%p631_p0, %s630_s23), 0 }
   0x9   :  { %s25_s26 = sadd.s32 %s1047_s23, %s20_s20 }
   0xa   :  { %s638_s27 = sshll.u32 %s25_s26, 8 }
   0xb   :  { %s31_s30 = scalar_lea.hbm %s1044_s4, %s638_s27 }
   0xc   :  { %s677_s6 = scalar_lea.hbm %s31_s30, 256  ;;  %p680_p2 = scmp.lt.s32.totalorder %s31_s30, %s1044_s4 }
   0xd   :  { %p678_p1 = scmp.ne.s32.totalorder %s31_s30, %s677_s6  ;;  %p681_p3 = scmp.lt.s32.totalorder %s679_s8, %s677_s6 }
   0xf   :  { %p682_p4 = por %p681_p3, %p680_p2 }
  0x11   :  { %p683_p5 = pnand %p682_p4, %p678_p1 }
  0x13   :  { %686 = shalt.err (!%p683_p5)
}
  0x14   :  { %s687_s11 = scalar_lea.vmem %s34_s25, 256  ;;  %p692_p7 = scmp.lt.s32.totalorder %s34_s25, %s34_s25 }
  0x15   :  { %p688_p6 = scmp.ne.s32.totalorder %s34_s25, %s687_s11  ;;  %p693_p8 = scmp.lt.s32.totalorder %s687_s11, %s687_s11 }
  0x17   :  { %p694_p9 = por %p693_p8, %p692_p7 }
  0x19   :  { %p695_p10 = pnand %p694_p9, %p688_p6 }
  0x1b   :  { %698 = shalt.err (!%p695_p10)
}
  0x1c   :  { %36 = dma.hbm_to_vmem [thread:$0]  %s31_s30, 256, %s34_s25, [#allocation7]  }
  0x1d   :  { %719 = dma.done.wait [#allocation7], 256  }
  0x1e   :  { %720 = vsyncadd [#allocation7], 4294967040  ;;  %v724_v0 = vmov 0.0   ;;  %p635_p11 = scmp.le.s32.totalorder %s1041_s1, 0 }
  0x1f   :  { %51 = vst [vmem:[#allocation2] sm:$0xff] %v724_v0  ;;  %s57_s4 = sld [smem:[#allocation4]] (!%p635_p11) }
  0x20   :  { %56 = sbr.rel (%p635_p11) target bundleno = 361 (0x169), region = 25 }
  0x25   :  { %v61_v1 = vlaneseq  ;;  %v534_v2 = vld [vmem:[#allocation6 + $0x8] sm:$0xff]  ;;  %v163_v4 = vld [vmem:[%s1042_s2] sm:$0xf]  ;;  %s636_s1 = sshll.u32 %s57_s4, 8 }
  0x26   :  { %599 = vmatprep.mubr.f32.mxu0 %v534_v2  ;;  %v797_v17 = vld [vmem:[%s1043_s3] ss:$0 sm:$0xff]  ;;  %v799_v18 = vstv %s636_s1 }
  0x27   :  { %v774_v3 = vshrl.u32 %v61_v1, 7 }
  0x29   :  { %v93_v5 = vadd.s32 248, %v774_v3  ;;  %v198_v6 = vsub.s32 0, %v774_v3  ;;  %v266_v7 = vsub.s32 1, %v774_v3  ;;  %v366_v8 = vsub.s32 2, %v774_v3 }
  0x2a   :  { %v466_v9 = vsub.s32 3, %v774_v3  ;;  %v77_v10 = vadd.s32 120, %v774_v3  ;;  %v92_v11 = vadd.s32 240, %v774_v3  ;;  %v76_v12 = vadd.s32 112, %v774_v3 }
  0x2b   :  { %v787_v13 = vrot.slane %v163_v4, %v198_v6  ;;  %v789_v14 = vrot.slane %v163_v4, %v266_v7  ;;  %v791_v15 = vrot.slane %v163_v4, %v366_v8  ;;  %v91_v16 = vadd.s32 232, %v774_v3 }
  0x2c   :  { %v801_v19 = vrot.slane %v163_v4, %v466_v9  ;;  %v75_v20 = vadd.s32 104, %v774_v3  ;;  %v90_v21 = vadd.s32 224, %v774_v3  ;;  %v126_v22 = vadd.s32 %v799_v18, %v93_v5 }
  0x2d   :  { %v110_v23 = vadd.s32 %v799_v18, %v77_v10  ;;  %v125_v24 = vadd.s32 %v799_v18, %v92_v11  ;;  %v109_v25 = vadd.s32 %v799_v18, %v76_v12  ;;  %v124_v26 = vadd.s32 %v799_v18, %v91_v16 }
  0x2e   :  { %v108_v27 = vadd.s32 %v799_v18, %v75_v20  ;;  %v123_v28 = vadd.s32 %v799_v18, %v90_v21  ;;  %v74_v29 = vadd.s32 96, %v774_v3  ;;  %v162_v30 = vsub.s32 %v126_v22, %v797_v17 }
  0x2f   :  { %v146_v31 = vsub.s32 %v110_v23, %v797_v17  ;;  %v161_v32 = vsub.s32 %v125_v24, %v797_v17  ;;  %v145_v33 = vsub.s32 %v109_v25, %v797_v17  ;;  %v160_v34 = vsub.s32 %v124_v26, %v797_v17 }
  0x30   :  { %v819_v35 = vsub.s32 %v108_v27, %v797_v17  ;;  %v822_v36 = vsub.s32 %v123_v28, %v797_v17  ;;  %v825_v37 = vadd.s32 %v799_v18, %v74_v29  ;;  %vm195_vm0 = vcmp.eq.s32.totalorder %v162_v30, 0 }
  0x31   :  { %vm263_vm1 = vcmp.eq.s32.totalorder %v162_v30, 1  ;;  %vm363_vm2 = vcmp.eq.s32.totalorder %v162_v30, 16  ;;  %vm463_vm3 = vcmp.eq.s32.totalorder %v162_v30, 17  ;;  %v231_v38 = vsel %vm195_vm0, %v787_v13, 0.0 }
  0x32   :  { %v299_v39 = vsel %vm263_vm1, %v789_v14, 0.0  ;;  %v399_v40 = vsel %vm363_vm2, %v791_v15, 0.0  ;;  %v499_v41 = vsel %vm463_vm3, %v801_v19, 0.0  ;;  %vm179_vm4 = vcmp.eq.s32.totalorder %v146_v31, 0 }
  0x33   :  { %v331_v42 = vadd.f32 %v299_v39, %v231_v38  ;;  %vm247_vm5 = vcmp.eq.s32.totalorder %v146_v31, 1  ;;  %vm347_vm6 = vcmp.eq.s32.totalorder %v146_v31, 16  ;;  %v215_v43 = vsel %vm179_vm4, %v787_v13, 0.0 }
  0x34   :  { %v283_v44 = vsel %vm247_vm5, %v789_v14, 0.0  ;;  %v383_v45 = vsel %vm347_vm6, %v791_v15, 0.0  ;;  %vm447_vm7 = vcmp.eq.s32.totalorder %v146_v31, 17  ;;  %vm194_vm8 = vcmp.eq.s32.totalorder %v161_v32, 0 }
  0x35   :  { %v431_v46 = vadd.f32 %v399_v40, %v331_v42  ;;  %v315_v47 = vadd.f32 %v283_v44, %v215_v43  ;;  %v483_v48 = vsel %vm447_vm7, %v801_v19, 0.0  ;;  %v230_v49 = vsel %vm194_vm8, %v787_v13, 0.0 }
  0x36   :  { %vm262_vm9 = vcmp.eq.s32.totalorder %v161_v32, 1  ;;  %vm362_vm10 = vcmp.eq.s32.totalorder %v161_v32, 16  ;;  %vm462_vm11 = vcmp.eq.s32.totalorder %v161_v32, 17  ;;  %vm178_vm12 = vcmp.eq.s32.totalorder %v145_v33, 0 }
  0x37   :  { %v531_v50 = vadd.f32 %v499_v41, %v431_v46  ;;  %v415_v51 = vadd.f32 %v383_v45, %v315_v47  ;;  %v298_v52 = vsel %vm262_vm9, %v789_v14, 0.0  ;;  %v398_v53 = vsel %vm362_vm10, %v791_v15, 0.0 }
  0x38   :  { %v330_v54 = vadd.f32 %v298_v52, %v230_v49  ;;  %v498_v55 = vsel %vm462_vm11, %v801_v19, 0.0  ;;  %vm246_vm13 = vcmp.eq.s32.totalorder %v145_v33, 1  ;;  %v214_v57 = vsel %vm178_vm12, %v787_v13, 0.0 }
  0x39   :  { %639 = vmatprep.subr.mxu0 %v531_v50  ;;  %v515_v56 = vadd.f32 %v483_v48, %v415_v51  ;;  %v282_v58 = vsel %vm246_vm13, %v789_v14, 0.0  ;;  %vm346_vm14 = vcmp.eq.s32.totalorder %v145_v33, 16  ;;  %vm446_vm15 = vcmp.eq.s32.totalorder %v145_v33, 17 }
  0x3a   :  { %v430_v59 = vadd.f32 %v398_v53, %v330_v54  ;;  %v314_v60 = vadd.f32 %v282_v58, %v214_v57  ;;  %v382_v61 = vsel %vm346_vm14, %v791_v15, 0.0  ;;  %v482_v62 = vsel %vm446_vm15, %v801_v19, 0.0 }
  0x3b   :  { %640 = vmatpush3.msra.mxu0 %v515_v56  ;;  %vm193_vm0 = vcmp.eq.s32.totalorder %v160_v34, 0  ;;  %vm261_vm1 = vcmp.eq.s32.totalorder %v160_v34, 1  ;;  %vm361_vm2 = vcmp.eq.s32.totalorder %v160_v34, 16  ;;  %vm461_vm3 = vcmp.eq.s32.totalorder %v160_v34, 17 }
  0x3c   :  { %v530_v63 = vadd.f32 %v498_v55, %v430_v59  ;;  %v414_v0 = vadd.f32 %v382_v61, %v314_v60  ;;  %v229_v1 = vsel %vm193_vm0, %v787_v13, 0.0  ;;  %v297_v2 = vsel %vm261_vm1, %v789_v14, 0.0 }
  0x3d   :  { %v329_v4 = vadd.f32 %v297_v2, %v229_v1  ;;  %v397_v5 = vsel %vm361_vm2, %v791_v15, 0.0  ;;  %vm177_vm4 = vcmp.eq.s32.totalorder %v819_v35, 0  ;;  %v497_v7 = vsel %vm461_vm3, %v801_v19, 0.0 }
  0x3e   :  { %641 = vmatprep.subr.mxu0 %v530_v63  ;;  %v514_v6 = vadd.f32 %v482_v62, %v414_v0  ;;  %v213_v8 = vsel %vm177_vm4, %v787_v13, 0.0  ;;  %vm245_vm5 = vcmp.eq.s32.totalorder %v819_v35, 1  ;;  %vm345_vm6 = vcmp.eq.s32.totalorder %v819_v35, 16 }
  0x3f   :  { %v429_v9 = vadd.f32 %v397_v5, %v329_v4  ;;  %v281_v10 = vsel %vm245_vm5, %v789_v14, 0.0  ;;  %vm445_vm7 = vcmp.eq.s32.totalorder %v819_v35, 17  ;;  %v381_v12 = vsel %vm345_vm6, %v791_v15, 0.0 }
  0x40   :  { %642 = vmatpush3.msra.mxu0 %v514_v6  ;;  %v313_v11 = vadd.f32 %v281_v10, %v213_v8  ;;  %v481_v16 = vsel %vm445_vm7, %v801_v19, 0.0  ;;  %vm192_vm8 = vcmp.eq.s32.totalorder %v822_v36, 0  ;;  %vm260_vm9 = vcmp.eq.s32.totalorder %v822_v36, 1 }
  0x41   :  { %v529_v20 = vadd.f32 %v497_v7, %v429_v9  ;;  %v228_v21 = vsel %vm192_vm8, %v787_v13, 0.0  ;;  %vm360_vm10 = vcmp.eq.s32.totalorder %v822_v36, 16  ;;  %v296_v23 = vsel %vm260_vm9, %v789_v14, 0.0 }
  0x42   :  { %v413_v22 = vadd.f32 %v381_v12, %v313_v11  ;;  %v396_v24 = vsel %vm360_vm10, %v791_v15, 0.0  ;;  %vm460_vm11 = vcmp.eq.s32.totalorder %v822_v36, 17  ;;  %v328_v25 = vadd.f32 %v296_v23, %v228_v21 }
  0x43   :  { %643 = vmatprep.subr.mxu0 %v529_v20  ;;  %v496_v26 = vsel %vm460_vm11, %v801_v19, 0.0  ;;  %v143_v27 = vsub.s32 %v825_v37, %v797_v17  ;;  %v89_v28 = vadd.s32 216, %v774_v3  ;;  %v73_v30 = vadd.s32 88, %v774_v3 }
  0x44   :  { %v513_v29 = vadd.f32 %v481_v16, %v413_v22  ;;  %v88_v31 = vadd.s32 208, %v774_v3  ;;  %v72_v32 = vadd.s32 80, %v774_v3  ;;  %v428_v33 = vadd.f32 %v396_v24, %v328_v25 }
  0x45   :  { %vm176_vm12 = vcmp.eq.s32.totalorder %v143_v27, 0  ;;  %vm244_vm13 = vcmp.eq.s32.totalorder %v143_v27, 1  ;;  %vm344_vm14 = vcmp.eq.s32.totalorder %v143_v27, 16  ;;  %vm444_vm15 = vcmp.eq.s32.totalorder %v143_v27, 17 }
  0x46   :  { %644 = vmatpush3.msra.mxu0 %v513_v29  ;;  %v212_v34 = vsel %vm176_vm12, %v787_v13, 0.0  ;;  %v280_v35 = vsel %vm244_vm13, %v789_v14, 0.0  ;;  %v380_v36 = vsel %vm344_vm14, %v791_v15, 0.0  ;;  %v528_v37 = vadd.f32 %v496_v26, %v428_v33 }
  0x47   :  { %v312_v38 = vadd.f32 %v280_v35, %v212_v34  ;;  %v480_v39 = vsel %vm444_vm15, %v801_v19, 0.0  ;;  %v122_v40 = vadd.s32 %v799_v18, %v89_v28  ;;  %v106_v41 = vadd.s32 %v799_v18, %v73_v30 }
  0x48   :  { %v121_v42 = vadd.s32 %v799_v18, %v88_v31  ;;  %v105_v43 = vadd.s32 %v799_v18, %v72_v32  ;;  %v87_v44 = vadd.s32 200, %v774_v3  ;;  %645 = vmatprep.subr.mxu0 %v528_v37  ;;  %v71_v47 = vadd.s32 72, %v774_v3 }
  0x49   :  { %v412_v45 = vadd.f32 %v380_v36, %v312_v38  ;;  %v158_v46 = vsub.s32 %v122_v40, %v797_v17  ;;  %v86_v48 = vadd.s32 192, %v774_v3  ;;  %v142_v49 = vsub.s32 %v106_v41, %v797_v17 }
  0x4a   :  { %v157_v50 = vsub.s32 %v121_v42, %v797_v17  ;;  %v141_v51 = vsub.s32 %v105_v43, %v797_v17  ;;  %v120_v52 = vadd.s32 %v799_v18, %v87_v44  ;;  %v104_v23 = vadd.s32 %v799_v18, %v71_v47 }
  0x4b   :  { %v512_v53 = vadd.f32 %v480_v39, %v412_v45  ;;  %vm191_vm0 = vcmp.eq.s32.totalorder %v158_v46, 0  ;;  %vm259_vm1 = vcmp.eq.s32.totalorder %v158_v46, 1  ;;  %vm359_vm2 = vcmp.eq.s32.totalorder %v158_v46, 16 }
  0x4c   :  { %v227_v54 = vsel %vm191_vm0, %v787_v13, 0.0  ;;  %v295_v55 = vsel %vm259_vm1, %v789_v14, 0.0  ;;  %v395_v56 = vsel %vm359_vm2, %v791_v15, 0.0  ;;  %vm459_vm3 = vcmp.eq.s32.totalorder %v158_v46, 17 }
  0x4d   :  { %646 = vmatpush3.msra.mxu0 %v512_v53  ;;  %v327_v57 = vadd.f32 %v295_v55, %v227_v54  ;;  %v495_v58 = vsel %vm459_vm3, %v801_v19, 0.0  ;;  %vm175_vm4 = vcmp.eq.s32.totalorder %v142_v49, 0  ;;  %vm243_vm5 = vcmp.eq.s32.totalorder %v142_v49, 1 }
  0x4e   :  { %v211_v59 = vsel %vm175_vm4, %v787_v13, 0.0  ;;  %v279_v60 = vsel %vm243_vm5, %v789_v14, 0.0  ;;  %vm343_vm6 = vcmp.eq.s32.totalorder %v142_v49, 16  ;;  %vm443_vm7 = vcmp.eq.s32.totalorder %v142_v49, 17 }
  0x4f   :  { %v427_v61 = vadd.f32 %v395_v56, %v327_v57  ;;  %v311_v62 = vadd.f32 %v279_v60, %v211_v59  ;;  %v379_v63 = vsel %vm343_vm6, %v791_v15, 0.0  ;;  %v479_v0 = vsel %vm443_vm7, %v801_v19, 0.0 }
  0x50   :  { %vm190_vm8 = vcmp.eq.s32.totalorder %v157_v50, 0  ;;  %vm258_vm9 = vcmp.eq.s32.totalorder %v157_v50, 1  ;;  %vm358_vm10 = vcmp.eq.s32.totalorder %v157_v50, 16  ;;  %vm458_vm11 = vcmp.eq.s32.totalorder %v157_v50, 17 }
  0x51   :  { %v527_v1 = vadd.f32 %v495_v58, %v427_v61  ;;  %v411_v2 = vadd.f32 %v379_v63, %v311_v62  ;;  %v226_v4 = vsel %vm190_vm8, %v787_v13, 0.0  ;;  %v294_v5 = vsel %vm258_vm9, %v789_v14, 0.0 }
  0x52   :  { %v326_v6 = vadd.f32 %v294_v5, %v226_v4  ;;  %v394_v7 = vsel %vm358_vm10, %v791_v15, 0.0  ;;  %v494_v8 = vsel %vm458_vm11, %v801_v19, 0.0  ;;  %vm174_vm12 = vcmp.eq.s32.totalorder %v141_v51, 0 }
  0x53   :  { %647 = vmatprep.subr.mxu0 %v527_v1  ;;  %v511_v9 = vadd.f32 %v479_v0, %v411_v2  ;;  %v210_v10 = vsel %vm174_vm12, %v787_v13, 0.0  ;;  %vm242_vm13 = vcmp.eq.s32.totalorder %v141_v51, 1  ;;  %vm342_vm14 = vcmp.eq.s32.totalorder %v141_v51, 16 }
  0x54   :  { %v426_v11 = vadd.f32 %v394_v7, %v326_v6  ;;  %v278_v12 = vsel %vm242_vm13, %v789_v14, 0.0  ;;  %v378_v16 = vsel %vm342_vm14, %v791_v15, 0.0  ;;  %vm442_vm15 = vcmp.eq.s32.totalorder %v141_v51, 17 }
  0x55   :  { %648 = vmatpush3.msra.mxu0 %v511_v9  ;;  %v310_v20 = vadd.f32 %v278_v12, %v210_v10  ;;  %v478_v21 = vsel %vm442_vm15, %v801_v19, 0.0  ;;  %v156_v22 = vsub.s32 %v120_v52, %v797_v17  ;;  %v119_v25 = vadd.s32 %v799_v18, %v86_v48 }
  0x56   :  { %v526_v24 = vadd.f32 %v494_v8, %v426_v11  ;;  %v70_v26 = vadd.s32 64, %v774_v3  ;;  %v85_v27 = vadd.s32 184, %v774_v3  ;;  %v140_v35 = vsub.s32 %v104_v23, %v797_v17 }
  0x57   :  { %v410_v28 = vadd.f32 %v378_v16, %v310_v20  ;;  %vm189_vm0 = vcmp.eq.s32.totalorder %v156_v22, 0  ;;  %vm257_vm1 = vcmp.eq.s32.totalorder %v156_v22, 1  ;;  %vm357_vm2 = vcmp.eq.s32.totalorder %v156_v22, 16 }
  0x58   :  { %649 = vmatprep.subr.mxu0 %v526_v24  ;;  %v225_v29 = vsel %vm189_vm0, %v787_v13, 0.0  ;;  %v293_v30 = vsel %vm257_vm1, %v789_v14, 0.0  ;;  %v393_v31 = vsel %vm357_vm2, %v791_v15, 0.0  ;;  %vm457_vm3 = vcmp.eq.s32.totalorder %v156_v22, 17 }
  0x59   :  { %v510_v32 = vadd.f32 %v478_v21, %v410_v28  ;;  %v325_v33 = vadd.f32 %v293_v30, %v225_v29  ;;  %v493_v34 = vsel %vm457_vm3, %v801_v19, 0.0  ;;  %v155_v36 = vsub.s32 %v119_v25, %v797_v17 }
  0x5a   :  { %v103_v37 = vadd.s32 %v799_v18, %v70_v26  ;;  %v118_v38 = vadd.s32 %v799_v18, %v85_v27  ;;  %v69_v39 = vadd.s32 56, %v774_v3  ;;  %vm173_vm4 = vcmp.eq.s32.totalorder %v140_v35, 0 }
  0x5b   :  { %650 = vmatpush3.msra.mxu0 %v510_v32  ;;  %v425_v40 = vadd.f32 %v393_v31, %v325_v33  ;;  %vm241_vm5 = vcmp.eq.s32.totalorder %v140_v35, 1  ;;  %vm341_vm6 = vcmp.eq.s32.totalorder %v140_v35, 16  ;;  %v209_v41 = vsel %vm173_vm4, %v787_v13, 0.0 }
  0x5c   :  { %v277_v42 = vsel %vm241_vm5, %v789_v14, 0.0  ;;  %v377_v43 = vsel %vm341_vm6, %v791_v15, 0.0  ;;  %vm441_vm7 = vcmp.eq.s32.totalorder %v140_v35, 17  ;;  %vm188_vm8 = vcmp.eq.s32.totalorder %v155_v36, 0 }
  0x5d   :  { %v525_v44 = vadd.f32 %v493_v34, %v425_v40  ;;  %v309_v45 = vadd.f32 %v277_v42, %v209_v41  ;;  %v477_v46 = vsel %vm441_vm7, %v801_v19, 0.0  ;;  %v224_v47 = vsel %vm188_vm8, %v787_v13, 0.0 }
  0x5e   :  { %vm256_vm9 = vcmp.eq.s32.totalorder %v155_v36, 1  ;;  %vm356_vm10 = vcmp.eq.s32.totalorder %v155_v36, 16  ;;  %vm456_vm11 = vcmp.eq.s32.totalorder %v155_v36, 17  ;;  %v139_v53 = vsub.s32 %v103_v37, %v797_v17 }
  0x5f   :  { %651 = vmatprep.subr.mxu0 %v525_v44  ;;  %v409_v48 = vadd.f32 %v377_v43, %v309_v45  ;;  %v292_v49 = vsel %vm256_vm9, %v789_v14, 0.0  ;;  %v392_v50 = vsel %vm356_vm10, %v791_v15, 0.0  ;;  %v492_v51 = vsel %vm456_vm11, %v801_v19, 0.0 }
  0x60   :  { %v324_v52 = vadd.f32 %v292_v49, %v224_v47  ;;  %v154_v54 = vsub.s32 %v118_v38, %v797_v17  ;;  %v102_v55 = vadd.s32 %v799_v18, %v69_v39  ;;  %v84_v57 = vadd.s32 176, %v774_v3 }
  0x61   :  { %v509_v56 = vadd.f32 %v477_v46, %v409_v48  ;;  %v68_v58 = vadd.s32 48, %v774_v3  ;;  %v83_v59 = vadd.s32 168, %v774_v3  ;;  %vm172_vm12 = vcmp.eq.s32.totalorder %v139_v53, 0 }
  0x62   :  { %v424_v60 = vadd.f32 %v392_v50, %v324_v52  ;;  %vm240_vm13 = vcmp.eq.s32.totalorder %v139_v53, 1  ;;  %vm340_vm14 = vcmp.eq.s32.totalorder %v139_v53, 16  ;;  %v208_v61 = vsel %vm172_vm12, %v787_v13, 0.0 }
  0x63   :  { %652 = vmatpush3.msra.mxu0 %v509_v56  ;;  %v276_v62 = vsel %vm240_vm13, %v789_v14, 0.0  ;;  %v376_v63 = vsel %vm340_vm14, %v791_v15, 0.0  ;;  %vm440_vm15 = vcmp.eq.s32.totalorder %v139_v53, 17  ;;  %vm187_vm0 = vcmp.eq.s32.totalorder %v154_v54, 0 }
  0x64   :  { %v524_v0 = vadd.f32 %v492_v51, %v424_v60  ;;  %v308_v1 = vadd.f32 %v276_v62, %v208_v61  ;;  %v476_v2 = vsel %vm440_vm15, %v801_v19, 0.0  ;;  %v223_v4 = vsel %vm187_vm0, %v787_v13, 0.0 }
  0x65   :  { %vm255_vm1 = vcmp.eq.s32.totalorder %v154_v54, 1  ;;  %vm355_vm2 = vcmp.eq.s32.totalorder %v154_v54, 16  ;;  %vm455_vm3 = vcmp.eq.s32.totalorder %v154_v54, 17  ;;  %v138_v10 = vsub.s32 %v102_v55, %v797_v17 }
  0x66   :  { %653 = vmatprep.subr.mxu0 %v524_v0  ;;  %v408_v5 = vadd.f32 %v376_v63, %v308_v1  ;;  %v291_v6 = vsel %vm255_vm1, %v789_v14, 0.0  ;;  %v391_v7 = vsel %vm355_vm2, %v791_v15, 0.0  ;;  %v491_v8 = vsel %vm455_vm3, %v801_v19, 0.0 }
  0x67   :  { %v323_v9 = vadd.f32 %v291_v6, %v223_v4  ;;  %v117_v11 = vadd.s32 %v799_v18, %v84_v57  ;;  %v101_v12 = vadd.s32 %v799_v18, %v68_v58  ;;  %v116_v20 = vadd.s32 %v799_v18, %v83_v59 }
  0x68   :  { %v508_v16 = vadd.f32 %v476_v2, %v408_v5  ;;  %v67_v21 = vadd.s32 40, %v774_v3  ;;  %v82_v22 = vadd.s32 160, %v774_v3  ;;  %vm171_vm4 = vcmp.eq.s32.totalorder %v138_v10, 0 }
  0x69   :  { %v423_v23 = vadd.f32 %v391_v7, %v323_v9  ;;  %vm239_vm5 = vcmp.eq.s32.totalorder %v138_v10, 1  ;;  %vm339_vm6 = vcmp.eq.s32.totalorder %v138_v10, 16  ;;  %v207_v24 = vsel %vm171_vm4, %v787_v13, 0.0 }
  0x6a   :  { %654 = vmatpush3.msra.mxu0 %v508_v16  ;;  %v275_v25 = vsel %vm239_vm5, %v789_v14, 0.0  ;;  %v375_v26 = vsel %vm339_vm6, %v791_v15, 0.0  ;;  %vm439_vm7 = vcmp.eq.s32.totalorder %v138_v10, 17  ;;  %v153_v30 = vsub.s32 %v117_v11, %v797_v17 }
  0x6b   :  { %v523_v27 = vadd.f32 %v491_v8, %v423_v23  ;;  %v307_v28 = vadd.f32 %v275_v25, %v207_v24  ;;  %v475_v29 = vsel %vm439_vm7, %v801_v19, 0.0  ;;  %v137_v31 = vsub.s32 %v101_v12, %v797_v17 }
  0x6c   :  { %v152_v32 = vsub.s32 %v116_v20, %v797_v17  ;;  %v100_v33 = vadd.s32 %v799_v18, %v67_v21  ;;  %v115_v34 = vadd.s32 %v799_v18, %v82_v22  ;;  %vm186_vm8 = vcmp.eq.s32.totalorder %v153_v30, 0 }
  0x6d   :  { %655 = vmatprep.subr.mxu0 %v523_v27  ;;  %v407_v35 = vadd.f32 %v375_v26, %v307_v28  ;;  %vm254_vm9 = vcmp.eq.s32.totalorder %v153_v30, 1  ;;  %vm354_vm10 = vcmp.eq.s32.totalorder %v153_v30, 16  ;;  %v222_v36 = vsel %vm186_vm8, %v787_v13, 0.0 }
  0x6e   :  { %v290_v37 = vsel %vm254_vm9, %v789_v14, 0.0  ;;  %v390_v38 = vsel %vm354_vm10, %v791_v15, 0.0  ;;  %vm454_vm11 = vcmp.eq.s32.totalorder %v153_v30, 17  ;;  %vm170_vm12 = vcmp.eq.s32.totalorder %v137_v31, 0 }
  0x6f   :  { %v507_v39 = vadd.f32 %v475_v29, %v407_v35  ;;  %v322_v40 = vadd.f32 %v290_v37, %v222_v36  ;;  %v490_v41 = vsel %vm454_vm11, %v801_v19, 0.0  ;;  %v206_v42 = vsel %vm170_vm12, %v787_v13, 0.0 }
  0x70   :  { %vm238_vm13 = vcmp.eq.s32.totalorder %v137_v31, 1  ;;  %vm338_vm14 = vcmp.eq.s32.totalorder %v137_v31, 16  ;;  %vm438_vm15 = vcmp.eq.s32.totalorder %v137_v31, 17  ;;  %vm185_vm0 = vcmp.eq.s32.totalorder %v152_v32, 0 }
  0x71   :  { %656 = vmatpush3.msra.mxu0 %v507_v39  ;;  %v422_v43 = vadd.f32 %v390_v38, %v322_v40  ;;  %v274_v44 = vsel %vm238_vm13, %v789_v14, 0.0  ;;  %v374_v45 = vsel %vm338_vm14, %v791_v15, 0.0  ;;  %v474_v46 = vsel %vm438_vm15, %v801_v19, 0.0 }
  0x72   :  { %v306_v47 = vadd.f32 %v274_v44, %v206_v42  ;;  %vm253_vm1 = vcmp.eq.s32.totalorder %v152_v32, 1  ;;  %vm353_vm2 = vcmp.eq.s32.totalorder %v152_v32, 16  ;;  %v221_v49 = vsel %vm185_vm0, %v787_v13, 0.0 }
  0x73   :  { %v522_v48 = vadd.f32 %v490_v41, %v422_v43  ;;  %v289_v50 = vsel %vm253_vm1, %v789_v14, 0.0  ;;  %v389_v51 = vsel %vm353_vm2, %v791_v15, 0.0  ;;  %vm453_vm3 = vcmp.eq.s32.totalorder %v152_v32, 17 }
  0x74   :  { %v406_v52 = vadd.f32 %v374_v45, %v306_v47  ;;  %v321_v53 = vadd.f32 %v289_v50, %v221_v49  ;;  %v136_v54 = vsub.s32 %v100_v33, %v797_v17  ;;  %v489_v55 = vsel %vm453_vm3, %v801_v19, 0.0 }
  0x75   :  { %657 = vmatprep.subr.mxu0 %v522_v48  ;;  %v151_v56 = vsub.s32 %v115_v34, %v797_v17  ;;  %v66_v57 = vadd.s32 32, %v774_v3  ;;  %v81_v58 = vadd.s32 152, %v774_v3  ;;  %v65_v16 = vadd.s32 24, %v774_v3 }
  0x76   :  { %v506_v59 = vadd.f32 %v474_v46, %v406_v52  ;;  %v421_v60 = vadd.f32 %v389_v51, %v321_v53  ;;  %vm169_vm4 = vcmp.eq.s32.totalorder %v136_v54, 0  ;;  %vm237_vm5 = vcmp.eq.s32.totalorder %v136_v54, 1 }
  0x77   :  { %v205_v61 = vsel %vm169_vm4, %v787_v13, 0.0  ;;  %v273_v62 = vsel %vm237_vm5, %v789_v14, 0.0  ;;  %vm337_vm6 = vcmp.eq.s32.totalorder %v136_v54, 16  ;;  %vm437_vm7 = vcmp.eq.s32.totalorder %v136_v54, 17 }
  0x78   :  { %658 = vmatpush3.msra.mxu0 %v506_v59  ;;  %v521_v63 = vadd.f32 %v489_v55, %v421_v60  ;;  %v305_v0 = vadd.f32 %v273_v62, %v205_v61  ;;  %v373_v1 = vsel %vm337_vm6, %v791_v15, 0.0  ;;  %v473_v2 = vsel %vm437_vm7, %v801_v19, 0.0 }
  0x79   :  { %vm184_vm8 = vcmp.eq.s32.totalorder %v151_v56, 0  ;;  %vm252_vm9 = vcmp.eq.s32.totalorder %v151_v56, 1  ;;  %vm352_vm10 = vcmp.eq.s32.totalorder %v151_v56, 16  ;;  %vm452_vm11 = vcmp.eq.s32.totalorder %v151_v56, 17 }
  0x7a   :  { %659 = vmatprep.subr.mxu0 %v521_v63  ;;  %v405_v4 = vadd.f32 %v373_v1, %v305_v0  ;;  %v220_v5 = vsel %vm184_vm8, %v787_v13, 0.0  ;;  %v288_v6 = vsel %vm252_vm9, %v789_v14, 0.0  ;;  %v388_v7 = vsel %vm352_vm10, %v791_v15, 0.0 }
  0x7b   :  { %v320_v8 = vadd.f32 %v288_v6, %v220_v5  ;;  %v488_v9 = vsel %vm452_vm11, %v801_v19, 0.0  ;;  %v99_v10 = vadd.s32 %v799_v18, %v66_v57  ;;  %v114_v11 = vadd.s32 %v799_v18, %v81_v58 }
  0x7c   :  { %v505_v12 = vadd.f32 %v473_v2, %v405_v4  ;;  %v80_v20 = vadd.s32 144, %v774_v3  ;;  %v64_v21 = vadd.s32 16, %v774_v3  ;;  %v79_v25 = vadd.s32 136, %v774_v3 }
  0x7d   :  { %v420_v22 = vadd.f32 %v388_v7, %v320_v8  ;;  %v135_v23 = vsub.s32 %v99_v10, %v797_v17  ;;  %v150_v24 = vsub.s32 %v114_v11, %v797_v17  ;;  %v98_v26 = vadd.s32 %v799_v18, %v65_v16 }
  0x7e   :  { %660 = vmatpush3.msra.mxu0 %v505_v12  ;;  %v113_v27 = vadd.s32 %v799_v18, %v80_v20  ;;  %v97_v28 = vadd.s32 %v799_v18, %v64_v21  ;;  %v63_v29 = vadd.s32 8, %v774_v3  ;;  %v112_v45 = vadd.s32 %v799_v18, %v79_v25 }
  0x7f   :  { %v520_v30 = vadd.f32 %v488_v9, %v420_v22  ;;  %vm168_vm12 = vcmp.eq.s32.totalorder %v135_v23, 0  ;;  %vm236_vm13 = vcmp.eq.s32.totalorder %v135_v23, 1  ;;  %vm336_vm14 = vcmp.eq.s32.totalorder %v135_v23, 16 }
  0x80   :  { %v204_v31 = vsel %vm168_vm12, %v787_v13, 0.0  ;;  %v272_v32 = vsel %vm236_vm13, %v789_v14, 0.0  ;;  %v372_v33 = vsel %vm336_vm14, %v791_v15, 0.0  ;;  %vm436_vm15 = vcmp.eq.s32.totalorder %v135_v23, 17 }
  0x81   :  { %661 = vmatprep.subr.mxu0 %v520_v30  ;;  %v304_v34 = vadd.f32 %v272_v32, %v204_v31  ;;  %v472_v35 = vsel %vm436_vm15, %v801_v19, 0.0  ;;  %vm183_vm0 = vcmp.eq.s32.totalorder %v150_v24, 0  ;;  %vm251_vm1 = vcmp.eq.s32.totalorder %v150_v24, 1 }
  0x82   :  { %v219_v36 = vsel %vm183_vm0, %v787_v13, 0.0  ;;  %v287_v37 = vsel %vm251_vm1, %v789_v14, 0.0  ;;  %vm351_vm2 = vcmp.eq.s32.totalorder %v150_v24, 16  ;;  %vm451_vm3 = vcmp.eq.s32.totalorder %v150_v24, 17 }
  0x83   :  { %v404_v38 = vadd.f32 %v372_v33, %v304_v34  ;;  %v319_v39 = vadd.f32 %v287_v37, %v219_v36  ;;  %v387_v40 = vsel %vm351_vm2, %v791_v15, 0.0  ;;  %v487_v41 = vsel %vm451_vm3, %v801_v19, 0.0 }
  0x84   :  { %v134_v42 = vsub.s32 %v98_v26, %v797_v17  ;;  %v149_v43 = vsub.s32 %v113_v27, %v797_v17  ;;  %v133_v44 = vsub.s32 %v97_v28, %v797_v17  ;;  %v96_v48 = vadd.s32 %v799_v18, %v63_v29 }
  0x85   :  { %v504_v46 = vadd.f32 %v472_v35, %v404_v38  ;;  %v419_v47 = vadd.f32 %v387_v40, %v319_v39  ;;  %v78_v49 = vadd.s32 128, %v774_v3  ;;  %v148_v6 = vsub.s32 %v112_v45, %v797_v17 }
  0x86   :  { %vm167_vm4 = vcmp.eq.s32.totalorder %v134_v42, 0  ;;  %vm235_vm5 = vcmp.eq.s32.totalorder %v134_v42, 1  ;;  %vm335_vm6 = vcmp.eq.s32.totalorder %v134_v42, 16  ;;  %vm435_vm7 = vcmp.eq.s32.totalorder %v134_v42, 17 }
  0x87   :  { %662 = vmatpush3.msra.mxu0 %v504_v46  ;;  %v519_v50 = vadd.f32 %v487_v41, %v419_v47  ;;  %v203_v51 = vsel %vm167_vm4, %v787_v13, 0.0  ;;  %v271_v52 = vsel %vm235_vm5, %v789_v14, 0.0  ;;  %v371_v53 = vsel %vm335_vm6, %v791_v15, 0.0  ;;  %v533_v46 = vld [vmem:[#allocation6] sm:$0xff]  ;;  %v532_v47 = vld [vmem:[#allocation2] sm:$0xff] }
  0x88   :  { %v303_v54 = vadd.f32 %v271_v52, %v203_v51  ;;  %v471_v55 = vsel %vm435_vm7, %v801_v19, 0.0  ;;  %vm182_vm8 = vcmp.eq.s32.totalorder %v149_v43, 0  ;;  %vm250_vm9 = vcmp.eq.s32.totalorder %v149_v43, 1 }
  0x89   :  { %663 = vmatprep.subr.mxu0 %v519_v50  ;;  %v218_v56 = vsel %vm182_vm8, %v787_v13, 0.0  ;;  %v286_v57 = vsel %vm250_vm9, %v789_v14, 0.0  ;;  %vm350_vm10 = vcmp.eq.s32.totalorder %v149_v43, 16  ;;  %vm450_vm11 = vcmp.eq.s32.totalorder %v149_v43, 17 }
  0x8a   :  { %v403_v58 = vadd.f32 %v371_v53, %v303_v54  ;;  %v318_v59 = vadd.f32 %v286_v57, %v218_v56  ;;  %v386_v60 = vsel %vm350_vm10, %v791_v15, 0.0  ;;  %v486_v61 = vsel %vm450_vm11, %v801_v19, 0.0 }
  0x8b   :  { %vm166_vm12 = vcmp.eq.s32.totalorder %v133_v44, 0  ;;  %vm234_vm13 = vcmp.eq.s32.totalorder %v133_v44, 1  ;;  %vm334_vm14 = vcmp.eq.s32.totalorder %v133_v44, 16  ;;  %vm434_vm15 = vcmp.eq.s32.totalorder %v133_v44, 17 }
  0x8c   :  { %v503_v62 = vadd.f32 %v471_v55, %v403_v58  ;;  %v418_v63 = vadd.f32 %v386_v60, %v318_v59  ;;  %v202_v0 = vsel %vm166_vm12, %v787_v13, 0.0  ;;  %v270_v1 = vsel %vm234_vm13, %v789_v14, 0.0 }
  0x8d   :  { %v302_v2 = vadd.f32 %v270_v1, %v202_v0  ;;  %v370_v4 = vsel %vm334_vm14, %v791_v15, 0.0  ;;  %v470_v5 = vsel %vm434_vm15, %v801_v19, 0.0  ;;  %v132_v8 = vsub.s32 %v96_v48, %v797_v17 }
  0x8e   :  { %664 = vmatpush3.msra.mxu0 %v503_v62  ;;  %v518_v7 = vadd.f32 %v486_v61, %v418_v63  ;;  %v111_v9 = vadd.s32 %v799_v18, %v78_v49  ;;  %v95_v10 = vadd.s32 %v799_v18, %v774_v3  ;;  %vm181_vm0 = vcmp.eq.s32.totalorder %v148_v6, 0 }
  0x8f   :  { %v402_v11 = vadd.f32 %v370_v4, %v302_v2  ;;  %vm249_vm1 = vcmp.eq.s32.totalorder %v148_v6, 1  ;;  %vm349_vm2 = vcmp.eq.s32.totalorder %v148_v6, 16  ;;  %v217_v12 = vsel %vm181_vm0, %v787_v13, 0.0 }
  0x90   :  { %665 = vmatprep.subr.mxu0 %v518_v7  ;;  %v285_v16 = vsel %vm249_vm1, %v789_v14, 0.0  ;;  %v385_v20 = vsel %vm349_vm2, %v791_v15, 0.0  ;;  %vm449_vm3 = vcmp.eq.s32.totalorder %v148_v6, 17  ;;  %vm165_vm4 = vcmp.eq.s32.totalorder %v132_v8, 0 }
  0x91   :  { %v502_v21 = vadd.f32 %v470_v5, %v402_v11  ;;  %v317_v22 = vadd.f32 %v285_v16, %v217_v12  ;;  %v485_v23 = vsel %vm449_vm3, %v801_v19, 0.0  ;;  %v201_v24 = vsel %vm165_vm4, %v787_v13, 0.0 }
  0x92   :  { %vm233_vm5 = vcmp.eq.s32.totalorder %v132_v8, 1  ;;  %vm333_vm6 = vcmp.eq.s32.totalorder %v132_v8, 16  ;;  %vm433_vm7 = vcmp.eq.s32.totalorder %v132_v8, 17  ;;  %v147_v27 = vsub.s32 %v111_v9, %v797_v17 }
  0x93   :  { %666 = vmatpush3.msra.mxu0 %v502_v21  ;;  %v417_v3 = vadd.f32 %v385_v20, %v317_v22  ;;  %v269_v18 = vsel %vm233_vm5, %v789_v14, 0.0  ;;  %v369_v25 = vsel %vm333_vm6, %v791_v15, 0.0  ;;  %v131_v28 = vsub.s32 %v95_v10, %v797_v17 }
  0x94   :  { %v301_v26 = vadd.f32 %v269_v18, %v201_v24  ;;  %v469_v30 = vsel %vm433_vm7, %v801_v19, 0.0  ;;  %vm180_vm8 = vcmp.eq.s32.totalorder %v147_v27, 0  ;;  %vm248_vm9 = vcmp.eq.s32.totalorder %v147_v27, 1 }
  0x95   :  { %v517_v29 = vadd.f32 %v485_v23, %v417_v3  ;;  %vm348_vm10 = vcmp.eq.s32.totalorder %v147_v27, 16  ;;  %v216_v32 = vsel %vm180_vm8, %v787_v13, 0.0  ;;  %v284_v33 = vsel %vm248_vm9, %v789_v14, 0.0 }
  0x96   :  { %v401_v31 = vadd.f32 %v369_v25, %v301_v26  ;;  %v384_v34 = vsel %vm348_vm10, %v791_v15, 0.0  ;;  %vm448_vm11 = vcmp.eq.s32.totalorder %v147_v27, 17  ;;  %v316_v36 = vadd.f32 %v284_v33, %v216_v32 }
  0x97   :  { %667 = vmatprep.subr.mxu0 %v517_v29  ;;  %v484_v37 = vsel %vm448_vm11, %v801_v19, 0.0  ;;  %vm164_vm12 = vcmp.eq.s32.totalorder %v131_v28, 0  ;;  %vm232_vm13 = vcmp.eq.s32.totalorder %v131_v28, 1  ;;  %vm332_vm14 = vcmp.eq.s32.totalorder %v131_v28, 16 }
  0x98   :  { %v501_v35 = vadd.f32 %v469_v30, %v401_v31  ;;  %v200_v17 = vsel %vm164_vm12, %v787_v13, 0.0  ;;  %vm432_vm15 = vcmp.eq.s32.totalorder %v131_v28, 17  ;;  %v416_v38 = vadd.f32 %v384_v34, %v316_v36 }
  0x99   :  { %v268_v39 = vsel %vm232_vm13, %v789_v14, 0.0  ;;  %v368_v40 = vsel %vm332_vm14, %v791_v15, 0.0  ;;  %v468_v43 = vsel %vm432_vm15, %v801_v19, 0.0 }
  0x9a   :  { %668 = vmatpush3.msra.mxu0 %v501_v35  ;;  %v300_v41 = vadd.f32 %v268_v39, %v200_v17  ;;  %v516_v42 = vadd.f32 %v484_v37, %v416_v38 }
  0x9c   :  { %v400_v44 = vadd.f32 %v368_v40, %v300_v41  ;;  %669 = vmatprep.subr.mxu0 %v516_v42 }
  0x9e   :  { %v500_v45 = vadd.f32 %v468_v43, %v400_v44 }
  0xa0   :  { %670 = vmatpush3.msra.mxu0 %v500_v45 }
  0xa1   :  { %600 = vmatmul.mubr.f32.vlgmr.msra.gmra.mxu0 %v533_v46 }
 0x161   :  { %v671_v13 = vpop.f32.mrf.mxu0 }
 0x163   :  { %v672_v48 = vpop.f32.mrf.mxu0 }
 0x164   :  { %v673_v49 = vadd.f32 %v672_v48, %v671_v13 }
 0x166   :  { %v605_v50 = vadd.f32 %v673_v49, %v532_v47 }
 0x168   :  { %606 = vst [vmem:[#allocation2] sm:$0xff] %v605_v50 }
 0x169 PF:  { %s725_s3 = smov [#allocation9]  }
 0x16a   :  { %s618_s17 = sshll.u32 %s725_s3, 4  ;;  %s619_s17 = int_to_ptr.vmem [resolvable:$true] %s618_s17 }
 0x16b   :  { %s699_s18 = scalar_lea.vmem %s619_s17, 128  ;;  %p704_p13 = scmp.lt.s32.totalorder %s619_s17, %s619_s17 }
 0x16c   :  { %p700_p12 = scmp.ne.s32.totalorder %s619_s17, %s699_s18  ;;  %p705_p0 = scmp.lt.s32.totalorder %s699_s18, %s699_s18 }
 0x16e   :  { %p706_p1 = por %p705_p0, %p704_p13 }
 0x16f   :  { %v610_v14 = vld [vmem:[#allocation2] sm:$0xff] }
 0x170   :  { %611 = vst [vmem:[#allocation9] sm:$0xff] %v610_v14  ;;  %p707_p2 = pnand %p706_p1, %p700_p12 }
 0x172   :  { %710 = shalt.err (!%p707_p2)
}
 0x173   :  { %621 = dma.vmem_to_hbm [thread:$0]  %s619_s17, 128, %s1045_s5, [#allocation8]  }
 0x174   :  { %721 = dma.done.wait [#allocation8], 128  }
 0x175   :  { %722 = vsyncadd [#allocation8], 4294967168 }
 0x176   :  { %625 = vsyncpa [#allocation7], 1 }
 0x177   :  { %626 = vsyncpa [#allocation8], 1 }

</bundles_post_ra>
